<compile_context>
chip_gen: v6e
topology: v6e:2x2x1
jax: 0.10.0
libtpu: 0.0.40
codegen_flags: <defaults>
</compile_context>

<pallas_src>
import functools

import jax
import jax.numpy as jnp
from jax.experimental import pallas as pl
from jax.experimental.pallas import tpu as pltpu


def gcn_fused_kernel(x_ref, adj_ref, w1_ref, b1_ref, w2_ref, b2_ref, out_ref):
    """Fused 2-layer GCN: out = log_softmax(adj @ (relu(adj @ (x@W1) + b1) @ W2) + b2)."""
    x = x_ref[...].astype(jnp.bfloat16)   # (N, NFEAT) f32 in HBM, cast in-kernel
    adj = adj_ref[...]                    # (N, N)       bf16 (pre-cast per graph)
    w1 = w1_ref[...]                      # (NFEAT, HPAD) bf16, zero-padded cols
    b1 = b1_ref[...]                      # (1, HPAD)     f32,  zero-padded
    w2 = w2_ref[...]                      # (HPAD, NCLASS) bf16, zero-padded rows
    b2 = b2_ref[...]                      # (1, NCLASS)    f32

    # ---- layer 1: h = relu(adj @ (x @ W1) + b1), lane-dense (N, HPAD) ----
    support1 = jnp.dot(x, w1, preferred_element_type=jnp.float32)            # f32 acc
    agg1 = jnp.dot(adj, support1.astype(jnp.bfloat16),
                   preferred_element_type=jnp.float32)                       # f32 acc
    # bias + relu in f32 (VPU); h stays a plain value (few vregs, no scratch).
    h = jnp.maximum(agg1 + b1, 0.0).astype(jnp.bfloat16)

    # TODO(synk): F.dropout(training=self.training) omitted -> inference mode
    # (identity); a training variant would use pltpu.prng_seed +
    # pltpu.stateful_bernoulli masking on h here.

    # ---- layer 2: logits = adj @ (h @ W2) + b2 ----
    support2 = jnp.dot(h, w2, preferred_element_type=jnp.float32)
    agg2 = jnp.dot(adj, support2.astype(jnp.bfloat16),
                   preferred_element_type=jnp.float32)
    logits = agg2 + b2                                                       # f32

    # ---- log_softmax along dim=1 (class axis), all f32 ----
    m = jnp.max(logits, axis=1, keepdims=True)
    shifted = logits - m
    lse = jnp.log(jnp.sum(jnp.exp(shifted), axis=1, keepdims=True))
    out_ref[...] = (shifted - lse).astype(out_ref.dtype)


def prepare_params(params):
    """One-time (model-build) padding + casting of the GCN weights.

    Zero-pads the hidden dimension to a lane-dense multiple of 128 and casts
    the MXU operands to bf16 (biases stay f32).  Done ONCE, never per forward.
    """
    (w1, b1), (w2, b2) = params
    nfeat, nhid = w1.shape
    nclass = w2.shape[1]
    hpad = max(128, pl.cdiv(nhid, 128) * 128)

    w1p = jnp.zeros((nfeat, hpad), jnp.float32).at[:, :nhid].set(
        w1.astype(jnp.float32)).astype(jnp.bfloat16)
    b1p = jnp.zeros((1, hpad), jnp.float32).at[:, :nhid].set(
        b1.astype(jnp.float32))
    w2p = jnp.zeros((hpad, nclass), jnp.float32).at[:nhid, :].set(
        w2.astype(jnp.float32)).astype(jnp.bfloat16)
    b2p = b2.reshape(1, nclass).astype(jnp.float32)

    prepared = (w1p, b1p, w2p, b2p)
    dims = dict(nfeat=nfeat, nhid=nhid, nclass=nclass, hpad=hpad)
    return prepared, dims


def prepare_graph(adj):
    """One-time per-graph cast of the (constant) adjacency to bf16."""
    return adj.astype(jnp.bfloat16)


@functools.partial(jax.jit, static_argnames=("nhid",))
def gcn_forward(x, adj_bf, w1p, b1p, w2p, b2p, *, nhid):
    """Single fused pallas_call; full arrays resident in VMEM (no grid)."""
    n, nfeat = x.shape
    hpad = w1p.shape[1]
    nclass = w2p.shape[1]

    # Advisory cost hint: flops with logical dims, bytes with transferred sizes.
    flops = 2 * n * (nfeat * nhid + n * nhid + nhid * nclass + n * nclass)
    bytes_accessed = (n * nfeat * 4 + n * n * 2 + nfeat * hpad * 2 + hpad * 4
                      + hpad * nclass * 2 + nclass * 4 + n * nclass * 4)
    cost = pl.CostEstimate(flops=flops,
                           transcendentals=n * nclass + n,   # exp + log
                           bytes_accessed=bytes_accessed)

    return pl.pallas_call(
        gcn_fused_kernel,
        out_shape=jax.ShapeDtypeStruct((n, nclass), jnp.float32),
        in_specs=[
            pl.BlockSpec((n, nfeat), lambda: (0, 0)),
            pl.BlockSpec((n, n), lambda: (0, 0)),
            pl.BlockSpec((nfeat, hpad), lambda: (0, 0)),
            pl.BlockSpec((1, hpad), lambda: (0, 0)),
            pl.BlockSpec((hpad, nclass), lambda: (0, 0)),
            pl.BlockSpec((1, nclass), lambda: (0, 0)),
        ],
        out_specs=pl.BlockSpec((n, nclass), lambda: (0, 0)),
        cost_estimate=cost,
    )(x, adj_bf, w1p, b1p, w2p, b2p)


def init_gc_params(key, in_features, out_features):
    """Matches pygcn GraphConvolution.reset_parameters: U(-stdv, stdv)."""
    stdv = 1.0 / jnp.sqrt(jnp.float32(out_features))
    kw, kb = jax.random.split(key)
    w = jax.random.uniform(kw, (in_features, out_features), jnp.float32,
                           minval=-stdv, maxval=stdv)
    b = jax.random.uniform(kb, (out_features,), jnp.float32,
                           minval=-stdv, maxval=stdv)
    return w, b


if __name__ == "__main__":
    # Small, deterministic problem: N=64 nodes, nfeat=32, nhid1=16, nclass=8.
    N, NFEAT, NHID1, NCLASS = 64, 32, 16, 8
    DROPOUT = 0.5  # unused in inference mode

    key = jax.random.PRNGKey(0)
    k_x, k_adj, k_gc1, k_gc2 = jax.random.split(key, 4)

    x = jax.random.normal(k_x, (N, NFEAT), jnp.float32)

    # Symmetric, row-normalized adjacency with self-loops (typical GCN input).
    a = (jax.random.uniform(k_adj, (N, N)) < 0.1).astype(jnp.float32)
    a = jnp.maximum(a, a.T) + jnp.eye(N, dtype=jnp.float32)
    adj = a / jnp.sum(a, axis=1, keepdims=True)

    params = (init_gc_params(k_gc1, NFEAT, NHID1),
              init_gc_params(k_gc2, NHID1, NCLASS))

    # One-time preparation (model build / per graph), NOT per forward.
    (w1p, b1p, w2p, b2p), dims = prepare_params(params)
    adj_bf = prepare_graph(adj)

    out = gcn_forward(x, adj_bf, w1p, b1p, w2p, b2p, nhid=dims["nhid"])
    out = jax.block_until_ready(out)

    # Pure-JAX f32 reference (tolerance check for the bf16 MXU path).
    def ref(x, adj, params):
        (w1, b1), (w2, b2) = params
        h = jnp.maximum(adj @ (x @ w1) + b1, 0.0)
        logits = adj @ (h @ w2) + b2
        return jax.nn.log_softmax(logits, axis=1)

    out_ref = ref(x, adj, params)

    # Sanity: correct shape, finite, rows sum (in prob space) to 1, close to ref.
    row_prob_sum = jnp.sum(jnp.exp(out), axis=1)
    assert out.shape == (N, NCLASS)
    assert bool(jnp.all(jnp.isfinite(out)))
    assert bool(jnp.all(jnp.abs(row_prob_sum - 1.0) < 1e-3))
    assert bool(jnp.max(jnp.abs(out - out_ref)) < 5e-2)   # bf16 MXU tolerance

    print("KERNEL_OK")
</pallas_src>

<mosaic_0001>
module attributes {stable_mosaic.version = 11 : i64} {
  func.func @gcn_fused_kernel(%arg0: memref<64x32xf32, #tpu.memory_space<vmem>>, %arg1: memref<64x64xbf16, #tpu.memory_space<vmem>>, %arg2: memref<32x128xbf16, #tpu.memory_space<vmem>>, %arg3: memref<1x128xf32, #tpu.memory_space<vmem>>, %arg4: memref<128x8xbf16, #tpu.memory_space<vmem>>, %arg5: memref<1x8xf32, #tpu.memory_space<vmem>>, %arg6: memref<64x8xf32, #tpu.memory_space<vmem>>) attributes {dimension_semantics = [], scalar_prefetch = 0 : i64, scratch_operands = 0 : i64, tpu.core_type = #tpu.core_type<tc>} {
    %c0 = arith.constant 0 : index
    %c0_0 = arith.constant 0 : index
    %0 = vector.load %arg0[%c0, %c0_0] : memref<64x32xf32, #tpu.memory_space<vmem>>, vector<64x32xf32>
    %1 = arith.truncf %0 : vector<64x32xf32> to vector<64x32xbf16>
    %c0_1 = arith.constant 0 : index
    %c0_2 = arith.constant 0 : index
    %2 = vector.load %arg1[%c0_1, %c0_2] : memref<64x64xbf16, #tpu.memory_space<vmem>>, vector<64x64xbf16>
    %c0_3 = arith.constant 0 : index
    %c0_4 = arith.constant 0 : index
    %3 = vector.load %arg2[%c0_3, %c0_4] : memref<32x128xbf16, #tpu.memory_space<vmem>>, vector<32x128xbf16>
    %c0_5 = arith.constant 0 : index
    %c0_6 = arith.constant 0 : index
    %4 = vector.load %arg3[%c0_5, %c0_6] : memref<1x128xf32, #tpu.memory_space<vmem>>, vector<1x128xf32>
    %c0_7 = arith.constant 0 : index
    %c0_8 = arith.constant 0 : index
    %5 = vector.load %arg4[%c0_7, %c0_8] : memref<128x8xbf16, #tpu.memory_space<vmem>>, vector<128x8xbf16>
    %c0_9 = arith.constant 0 : index
    %c0_10 = arith.constant 0 : index
    %6 = vector.load %arg5[%c0_9, %c0_10] : memref<1x8xf32, #tpu.memory_space<vmem>>, vector<1x8xf32>
    %cst = arith.constant dense<0.000000e+00> : vector<64x128xf32>
    %7 = tpu.matmul %1, %3, %cst {dimension_numbers = #tpu.dot_dimension_numbers<[1], [0], [0], [1], [0, 0, 1, 1], [], []>} : vector<64x32xbf16>, vector<32x128xbf16>, vector<64x128xf32> -> vector<64x128xf32>
    %8 = arith.truncf %7 : vector<64x128xf32> to vector<64x128xbf16>
    %cst_11 = arith.constant dense<0.000000e+00> : vector<64x128xf32>
    %9 = tpu.matmul %2, %8, %cst_11 {dimension_numbers = #tpu.dot_dimension_numbers<[1], [0], [0], [1], [0, 0, 1, 1], [], []>} : vector<64x64xbf16>, vector<64x128xbf16>, vector<64x128xf32> -> vector<64x128xf32>
    %10 = vector.broadcast %4 : vector<1x128xf32> to vector<64x128xf32>
    %11 = arith.addf %9, %10 : vector<64x128xf32>
    %cst_12 = arith.constant 0.000000e+00 : f32
    %12 = vector.broadcast %cst_12 : f32 to vector<64x128xf32>
    %13 = arith.maximumf %11, %12 : vector<64x128xf32>
    %14 = arith.truncf %13 : vector<64x128xf32> to vector<64x128xbf16>
    %cst_13 = arith.constant dense<0.000000e+00> : vector<64x8xf32>
    %15 = tpu.matmul %14, %5, %cst_13 {dimension_numbers = #tpu.dot_dimension_numbers<[1], [0], [0], [1], [0, 0, 1, 1], [], []>} : vector<64x128xbf16>, vector<128x8xbf16>, vector<64x8xf32> -> vector<64x8xf32>
    %16 = arith.truncf %15 : vector<64x8xf32> to vector<64x8xbf16>
    %cst_14 = arith.constant dense<0.000000e+00> : vector<64x8xf32>
    %17 = tpu.matmul %2, %16, %cst_14 {dimension_numbers = #tpu.dot_dimension_numbers<[1], [0], [0], [1], [0, 0, 1, 1], [], []>} : vector<64x64xbf16>, vector<64x8xbf16>, vector<64x8xf32> -> vector<64x8xf32>
    %18 = vector.broadcast %6 : vector<1x8xf32> to vector<64x8xf32>
    %19 = arith.addf %17, %18 : vector<64x8xf32>
    %cst_15 = arith.constant dense<0xFF800000> : vector<64xf32>
    %20 = vector.multi_reduction <maximumf>, %19, %cst_15 [1] : vector<64x8xf32> to vector<64xf32>
    %21 = vector.shape_cast %20 : vector<64xf32> to vector<64x1xf32>
    %22 = vector.broadcast %21 : vector<64x1xf32> to vector<64x8xf32>
    %23 = arith.subf %19, %22 : vector<64x8xf32>
    %24 = math.exp %23 : vector<64x8xf32>
    %cst_16 = arith.constant dense<0.000000e+00> : vector<64xf32>
    %25 = vector.multi_reduction <add>, %24, %cst_16 [1] : vector<64x8xf32> to vector<64xf32>
    %26 = vector.shape_cast %25 : vector<64xf32> to vector<64x1xf32>
    %27 = math.log %26 : vector<64x1xf32>
    %28 = vector.broadcast %27 : vector<64x1xf32> to vector<64x8xf32>
    %29 = arith.subf %23, %28 : vector<64x8xf32>
    %c0_17 = arith.constant 0 : index
    %c0_18 = arith.constant 0 : index
    %30 = vector.load %arg6[%c0_17, %c0_18] : memref<64x8xf32, #tpu.memory_space<vmem>>, vector<64x8xf32>
    tpu.vector_store %arg6[%c0_17, %c0_18], %29 {strides = array<i32>} : memref<64x8xf32, #tpu.memory_space<vmem>>, vector<64x8xf32>,
    return
  }
}

</mosaic_0001>

<bundles_post_ra>
// kernel: gcn_forward.1
= control target key start
LH: loop header
LB: loop body
LE: loop exit
PB: predicated region body
PF: predicated region fallthrough
CT: control target
= control target key end

     0   :  { %vm78_vm0 = vcmask 261120   ;;  %vm186_vm1 = vcmask 523264   ;;  %vm464_vm2 = vcmask 64512   ;;  %s960_s2 = inlined_call_operand.vmem [shape: bf16[32,128], index: 2, kind: input, shape index: {}]   ;;  %s961_s0 = inlined_call_operand.vmem [shape: f32[64,32], index: 0, kind: input, shape index: {}]   ;;  %s962_s1 = inlined_call_operand.vmem [shape: bf16[64,64], index: 1, kind: input, shape index: {}]   ;;  %s963_s4 = inlined_call_operand.vmem [shape: bf16[128,8], index: 4, kind: input, shape index: {}]   ;;  %s964_s3 = inlined_call_operand.vmem [shape: f32[1,128], index: 3, kind: input, shape index: {}]   ;;  %s965_s5 = inlined_call_operand.vmem [shape: f32[1,8], index: 5, kind: input, shape index: {}]   ;;  %s966_s6 = inlined_call_operand.vmem [shape: f32[64,8], index: 6, kind: output, shape index: {}]  }
   0x1   :  { %v703_v0 = vld [vmem:[%s960_s2 + $0x8] sm:$0xff]   ;;  %v704_v1 = vld [vmem:[%s960_s2] sm:$0xff]   ;;  %v26_v5 = vld [vmem:[%s961_s0 + $0x10] sm:$0xff] }
   0x2   :  { %635 = vmatprep.subr.bf16.mxu0 %v703_v0  ;;  %v24_v2 = vld [vmem:[%s961_s0] sm:$0xff]  ;;  %v25_v3 = vld [vmem:[%s961_s0 + $0x8] sm:$0xff]  ;;  %v27_v6 = vld [vmem:[%s961_s0 + $0x18] sm:$0xff] }
   0x3   :  { %636 = vmatpush3.bf16.msra.mxu0 %v703_v0  ;;  %v32_v4 = vpack.c.bf16 %v25_v3, %v24_v2  ;;  %v28_v7 = vld [vmem:[%s961_s0 + $0x20] sm:$0xff]  ;;  %v29_v8 = vld [vmem:[%s961_s0 + $0x28] sm:$0xff]  ;;  %v33_v9 = vpack.c.bf16 %v27_v6, %v26_v5  ;;  %v30_v11 = vld [vmem:[%s961_s0 + $0x30] sm:$0xff] }
   0x4   :  { %637 = vmatprep.subr.bf16.mxu0 %v704_v1  ;;  %v34_v10 = vpack.c.bf16 %v29_v8, %v28_v7  ;;  %v31_v12 = vld [vmem:[%s961_s0 + $0x38] sm:$0xff]  ;;  %v705_v14 = vld [vmem:[%s962_s1] sm:$0xff]   ;;  %v710_v16 = vld [vmem:[%s963_s4 + $0x30] sm:$0xff]  }
   0x5   :  { %639 = vmatprep.mubr.msk.bf16.mxu0 %vm78_vm0, %v32_v4  ;;  %v35_v13 = vpack.c.bf16 %v31_v12, %v30_v11  ;;  %655 = vmatprep.mubr.msk.bf16.mxu1 %vm186_vm1, %v705_v14  ;;  %v709_v15 = vld [vmem:[%s963_s4 + $0x38] sm:$0xff]   ;;  %v711_v17 = vld [vmem:[%s963_s4 + $0x28] sm:$0xff]   ;;  %v712_v18 = vld [vmem:[%s963_s4 + $0x20] sm:$0xff]  }
   0x6   :  { %v713_v19 = vld [vmem:[%s963_s4 + $0x18] sm:$0xff]   ;;  %v840_v32 = vld [vmem:[%s962_s1 + $0x8] sm:$0xff]   ;;  %v845_v33 = vld [vmem:[%s962_s1 + $0x10] sm:$0xff]  }
   0x7   :  { %638 = vmatpush3.bf16.msra.mxu0 %v704_v1  ;;  %v854_v34 = vld [vmem:[%s962_s1 + $0x18] sm:$0xff]   ;;  %v714_v35 = vld [vmem:[%s963_s4 + $0x10] sm:$0xff]   ;;  %v715_v36 = vld [vmem:[%s963_s4 + $0x8] sm:$0xff]  }
   0x8   :  { %663 = vmatprep.subr.bf16.mxu0 %v709_v15  ;;  %v716_v37 = vld [vmem:[%s963_s4] sm:$0xff]  }
   0x9   :  { %v579_v40 = vld [vmem:[%s964_s3] ss:$0 sm:$0xff] }
   0xa   :  { %640 = vmatmul.mubr.msk.bf16.vlgmr.msra.gmra.mxu0 %vm78_vm0, %v33_v9 }
   0xb   :  { %643 = vmatprep.mubr.msk.bf16.mxu0 %vm78_vm0, %v34_v10  ;;  %664 = vmatpush3.bf16.msra.mxu0 %v709_v15  ;;  %v596_v15 = vld [vmem:[%s965_s5] ss:$0 sm:$0xff] }
   0xc   :  { %665 = vmatprep.subr.bf16.mxu0 %v710_v16 }
   0xf   :  { %666 = vmatpush3.bf16.msra.mxu0 %v710_v16 }
  0x10   :  { %667 = vmatprep.subr.bf16.mxu0 %v711_v17 }
  0x12   :  { %644 = vmatmul.mubr.msk.bf16.gmra.mxu0 %vm78_vm0, %v35_v13 }
  0x13   :  { %668 = vmatpush3.bf16.msra.mxu0 %v711_v17 }
  0x14   :  { %669 = vmatprep.subr.bf16.mxu0 %v712_v18 }
  0x17   :  { %670 = vmatpush3.bf16.msra.mxu0 %v712_v18 }
  0x18   :  { %671 = vmatprep.subr.bf16.mxu0 %v713_v19 }
  0x1b   :  { %672 = vmatpush3.bf16.msra.mxu0 %v713_v19 }
  0x1c   :  { %673 = vmatprep.subr.bf16.mxu0 %v714_v35 }
  0x1f   :  { %674 = vmatpush3.bf16.msra.mxu0 %v714_v35 }
  0x20   :  { %675 = vmatprep.subr.bf16.mxu0 %v715_v36 }
  0x23   :  { %676 = vmatpush3.bf16.msra.mxu0 %v715_v36 }
  0x24   :  { %677 = vmatprep.subr.bf16.mxu0 %v716_v37 }
  0x27   :  { %678 = vmatpush3.bf16.msra.mxu0 %v716_v37 }
  0xca   :  { %v641_v20 = vpop.f32.mrf.mxu0 }
  0xcc   :  { %v125_v21 = vpop.f32.mrf.mxu0 }
  0xce   :  { %v642_v22 = vpop.f32.mrf.mxu0 }
  0xcf   :  { %v157_v30 = vpack.c.bf16 %v642_v22, %v641_v20 }
  0xd0   :  { %v128_v23 = vpop.f32.mrf.mxu0 }
  0xd1   :  { %v156_v31 = vpack.c.bf16 %v128_v23, %v125_v21 }
  0xd2   :  { %v645_v24 = vpop.f32.mrf.mxu0 }
  0xd4   :  { %v141_v25 = vpop.f32.mrf.mxu0 }
  0xd6   :  { %v646_v26 = vpop.f32.mrf.mxu0 }
  0xd7   :  { %v159_v27 = vpack.c.bf16 %v646_v26, %v645_v24 }
  0xd8   :  { %v144_v28 = vpop.f32.mrf.mxu0 }
  0xd9   :  { %v158_v29 = vpack.c.bf16 %v144_v28, %v141_v25  ;;  %647 = vmatprep.subr.bf16.mxu1 %v159_v27 }
  0xda   :  { %648 = vmatpush3.bf16.msra.mxu1 %v159_v27 }
  0xdb   :  { %649 = vmatprep.subr.bf16.mxu1 %v158_v29 }
  0xde   :  { %650 = vmatpush3.bf16.msra.mxu1 %v158_v29 }
  0xdf   :  { %651 = vmatprep.subr.bf16.mxu1 %v157_v30 }
  0xe2   :  { %652 = vmatpush3.bf16.msra.mxu1 %v157_v30 }
  0xe3   :  { %653 = vmatprep.subr.bf16.mxu1 %v156_v31 }
  0xe6   :  { %654 = vmatpush3.bf16.msra.mxu1 %v156_v31 }
  0xe9   :  { %656 = vmatmul.mubr.msk.bf16.vlgmr.msra.gmra.mxu1 %vm186_vm1, %v840_v32 }
  0xea   :  { %659 = vmatprep.mubr.msk.bf16.mxu1 %vm186_vm1, %v845_v33 }
  0xf1   :  { %660 = vmatmul.mubr.msk.bf16.gmra.mxu1 %vm186_vm1, %v854_v34 }
  0xf2   :  { %695 = vmatprep.mubr.msk.bf16.mxu1 %vm186_vm1, %v705_v14 }
 0x1a9   :  { %v657_v38 = vpop.f32.mrf.mxu1 }
 0x1aa   :  { %v242_v44 = vadd.f32 %v657_v38, %v579_v40 }
 0x1ab   :  { %v233_v39 = vpop.f32.mrf.mxu1 }
 0x1ac   :  { %v234_v42 = vadd.f32 %v579_v40, %v233_v39  ;;  %v266_v51 = vmax.f32 %v242_v44, 0.0 }
 0x1ad   :  { %v658_v41 = vpop.f32.mrf.mxu1 }
 0x1ae   :  { %v245_v43 = vadd.f32 %v658_v41, %v579_v40  ;;  %v264_v49 = vmax.f32 %v234_v42, 0.0 }
 0x1af   :  { %v236_v45 = vpop.f32.mrf.mxu1 }
 0x1b0   :  { %v237_v46 = vadd.f32 %v579_v40, %v236_v45  ;;  %v267_v47 = vmax.f32 %v245_v43, 0.0 }
 0x1b1   :  { %v661_v48 = vpop.f32.mrf.mxu1 }
 0x1b2   :  { %v265_v50 = vmax.f32 %v237_v46, 0.0  ;;  %v273_v54 = vpack.c.bf16 %v267_v47, %v266_v51  ;;  %v258_v58 = vadd.f32 %v661_v48, %v579_v40 }
 0x1b3   :  { %v249_v52 = vpop.f32.mrf.mxu1 }
 0x1b4   :  { %v272_v53 = vpack.c.bf16 %v265_v50, %v264_v49  ;;  %v250_v56 = vadd.f32 %v579_v40, %v249_v52  ;;  %v270_v0 = vmax.f32 %v258_v58, 0.0 }
 0x1b5   :  { %v662_v55 = vpop.f32.mrf.mxu1 }
 0x1b6   :  { %v261_v57 = vadd.f32 %v662_v55, %v579_v40  ;;  %679 = vmatprep.mubr.bf16.mxu0 %v272_v53  ;;  %v268_v62 = vmax.f32 %v250_v56, 0.0 }
 0x1b7   :  { %v252_v59 = vpop.f32.mrf.mxu1  ;;  %680 = vmatmul.mubr.bf16.vlgmr.msra.gmra.mxu0 %v273_v54 }
 0x1b8   :  { %v253_v60 = vadd.f32 %v579_v40, %v252_v59  ;;  %v271_v61 = vmax.f32 %v261_v57, 0.0 }
 0x1ba   :  { %v269_v63 = vmax.f32 %v253_v60, 0.0  ;;  %v275_v2 = vpack.c.bf16 %v271_v61, %v270_v0 }
 0x1bc   :  { %v274_v1 = vpack.c.bf16 %v269_v63, %v268_v62 }
 0x1be   :  { %683 = vmatprep.mubr.bf16.mxu0 %v274_v1 }
 0x1bf   :  { %684 = vmatmul.mubr.bf16.gmra.mxu0 %v275_v2 }
 0x277   :  { %v681_v3 = vpop.f32.mrf.mxu0 }
 0x279   :  { %v358_v4 = vpop.f32.mrf.mxu0 }
 0x27b   :  { %v682_v5 = vpop.f32.mrf.mxu0 }
 0x27c   :  { %v390_v13 = vpack.c.bf16 %v682_v5, %v681_v3 }
 0x27d   :  { %v361_v6 = vpop.f32.mrf.mxu0 }
 0x27e   :  { %v389_v14 = vpack.c.bf16 %v361_v6, %v358_v4 }
 0x27f   :  { %v685_v7 = vpop.f32.mrf.mxu0 }
 0x281   :  { %v374_v8 = vpop.f32.mrf.mxu0 }
 0x283   :  { %v686_v9 = vpop.f32.mrf.mxu0 }
 0x284   :  { %v392_v10 = vpack.c.bf16 %v686_v9, %v685_v7 }
 0x285   :  { %v377_v11 = vpop.f32.mrf.mxu0 }
 0x286   :  { %v391_v12 = vpack.c.bf16 %v377_v11, %v374_v8  ;;  %687 = vmatprep.subr.bf16.mxu1 %v392_v10 }
 0x287   :  { %688 = vmatpush3.bf16.msra.mxu1 %v392_v10 }
 0x288   :  { %689 = vmatprep.subr.bf16.mxu1 %v391_v12 }
 0x28b   :  { %690 = vmatpush3.bf16.msra.mxu1 %v391_v12 }
 0x28c   :  { %691 = vmatprep.subr.bf16.mxu1 %v390_v13 }
 0x28f   :  { %692 = vmatpush3.bf16.msra.mxu1 %v390_v13 }
 0x290   :  { %693 = vmatprep.subr.bf16.mxu1 %v389_v14 }
 0x293   :  { %694 = vmatpush3.bf16.msra.mxu1 %v389_v14 }
 0x296   :  { %696 = vmatmul.mubr.msk.bf16.vlgmr.msra.gmra.mxu1 %vm186_vm1, %v840_v32 }
 0x297   :  { %699 = vmatprep.mubr.msk.bf16.mxu1 %vm186_vm1, %v845_v33 }
 0x29e   :  { %700 = vmatmul.mubr.msk.bf16.gmra.mxu1 %vm186_vm1, %v854_v34 }
 0x356   :  { %v697_v16 = vpop.f32.mrf.mxu1 }
 0x357   :  { %v442_v17 = vadd.f32 %v697_v16, %v596_v15 }
 0x358   :  { %v433_v18 = vpop.f32.mrf.mxu1 }
 0x359   :  { %v434_v19 = vadd.f32 %v596_v15, %v433_v18  ;;  %v471_v20 = vsel %vm464_vm2, %v442_v17, -inf }
 0x35a   :  { %472 = vmax.xlane.f32.xlu1 %v471_v20  ;;  %v698_v21 = vpop.f32.mrf.mxu1 }
 0x35b   :  { %v445_v22 = vadd.f32 %v698_v21, %v596_v15  ;;  %v465_v23 = vsel %vm464_vm2, %v434_v19, -inf }
 0x35c   :  { %v436_v24 = vpop.f32.mrf.mxu1  ;;  %466 = vmax.xlane.f32.xlu0 %v465_v23 }
 0x35d   :  { %v437_v25 = vadd.f32 %v596_v15, %v436_v24  ;;  %v474_v26 = vsel %vm464_vm2, %v445_v22, -inf }
 0x35e   :  { %475 = vmax.xlane.f32.xlu1 %v474_v26  ;;  %v701_v27 = vpop.f32.mrf.mxu1 }
 0x35f   :  { %v468_v28 = vsel %vm464_vm2, %v437_v25, -inf  ;;  %v458_v32 = vadd.f32 %v701_v27, %v596_v15 }
 0x360   :  { %v449_v29 = vpop.f32.mrf.mxu1  ;;  %469 = vmax.xlane.f32.xlu0 %v468_v28 }
 0x361   :  { %v450_v30 = vadd.f32 %v596_v15, %v449_v29  ;;  %v483_v38 = vsel %vm464_vm2, %v458_v32, -inf }
 0x362   :  { %v702_v31 = vpop.f32.mrf.mxu1 }
 0x363   :  { %v477_v33 = vsel %vm464_vm2, %v450_v30, -inf  ;;  %v461_v36 = vadd.f32 %v702_v31, %v596_v15 }
 0x364   :  { %v452_v34 = vpop.f32.mrf.mxu1  ;;  %478 = vmax.xlane.f32.xlu0 %v477_v33 }
 0x365   :  { %v453_v35 = vadd.f32 %v596_v15, %v452_v34  ;;  %v486_v39 = vsel %vm464_vm2, %v461_v36, -inf }
 0x367   :  { %v480_v37 = vsel %vm464_vm2, %v453_v35, -inf }
 0x368   :  { %481 = vmax.xlane.f32.xlu1 %v480_v37  ;;  %484 = vmax.xlane.f32.xlu0 %v483_v38 }
 0x36c   :  { %487 = vmax.xlane.f32.xlu1 %v486_v39 }
 0x3e3   :  { %v473_v40 = vpop.xlane.xlu1 %472 }
 0x3e4   :  { %v888_v41 = vsub.f32 %v442_v17, %v473_v40 }
 0x3e5   :  { %v467_v42 = vpop.xlane.xlu0 %466 }
 0x3e6   :  { %v501_v43 = vmul.f32 1.442695, %v888_v41  ;;  %v891_v44 = vsub.f32 %v434_v19, %v467_v42 }
 0x3e7   :  { %v476_v45 = vpop.xlane.xlu1 %475 }
 0x3e8   :  { %717 = vpow2.f32 %v501_v43  ;;  %v497_v46 = vmul.f32 1.442695, %v891_v44  ;;  %v894_v47 = vsub.f32 %v445_v22, %v476_v45 }
 0x3e9   :  { %v470_v48 = vpop.xlane.xlu0 %469 }
 0x3ea   :  { %719 = vpow2.f32 %v497_v46  ;;  %v503_v49 = vmul.f32 1.442695, %v894_v47  ;;  %v897_v50 = vsub.f32 %v437_v25, %v470_v48 }
 0x3ec   :  { %721 = vpow2.f32 %v503_v49  ;;  %v499_v51 = vmul.f32 1.442695, %v897_v50 }
 0x3ed   :  { %v479_v52 = vpop.xlane.xlu0 %478 }
 0x3ee   :  { %723 = vpow2.f32 %v499_v51  ;;  %v900_v53 = vsub.f32 %v450_v30, %v479_v52 }
 0x3f0   :  { %v505_v54 = vmul.f32 1.442695, %v900_v53 }
 0x3f1   :  { %v482_v55 = vpop.xlane.xlu1 %481  ;;  %v485_v56 = vpop.xlane.xlu0 %484 }
 0x3f2   :  { %725 = vpow2.f32 %v505_v54  ;;  %v903_v57 = vsub.f32 %v453_v35, %v482_v55  ;;  %v905_v58 = vsub.f32 %v458_v32, %v485_v56 }
 0x3f4   :  { %v507_v59 = vmul.f32 1.442695, %v903_v57  ;;  %v509_v60 = vmul.f32 1.442695, %v905_v58 }
 0x3f5   :  { %v718_v61 = vpop.eup %717  ;;  %v488_v62 = vpop.xlane.xlu1 %487 }
 0x3f6   :  { %727 = vpow2.f32 %v507_v59  ;;  %v909_v63 = vsub.f32 %v461_v36, %v488_v62  ;;  %v519_v0 = vsel %vm464_vm2, %v718_v61, 0.0 }
 0x3f7   :  { %v720_v1 = vpop.eup %719  ;;  %729 = vpow2.f32 %v509_v60  ;;  %520 = vadd.xlane.f32.xlu0 %v519_v0 }
 0x3f8   :  { %v511_v2 = vmul.f32 1.442695, %v909_v63  ;;  %v513_v5 = vsel %vm464_vm2, %v720_v1, 0.0 }
 0x3f9   :  { %v722_v3 = vpop.eup %721 }
 0x3fa   :  { %731 = vpow2.f32 %v511_v2  ;;  %v522_v4 = vsel %vm464_vm2, %v722_v3, 0.0 }
 0x3fb   :  { %v724_v6 = vpop.eup %723  ;;  %523 = vadd.xlane.f32.xlu1 %v522_v4  ;;  %514 = vadd.xlane.f32.xlu0 %v513_v5 }
 0x3fc   :  { %v516_v7 = vsel %vm464_vm2, %v724_v6, 0.0 }
 0x3ff   :  { %v726_v8 = vpop.eup %725  ;;  %517 = vadd.xlane.f32.xlu1 %v516_v7 }
 0x400   :  { %v525_v9 = vsel %vm464_vm2, %v726_v8, 0.0 }
 0x401   :  { %526 = vadd.xlane.f32.xlu0 %v525_v9 }
 0x403   :  { %v728_v10 = vpop.eup %727 }
 0x404   :  { %v730_v11 = vpop.eup %729  ;;  %v528_v12 = vsel %vm464_vm2, %v728_v10, 0.0 }
 0x405   :  { %529 = vadd.xlane.f32.xlu1 %v528_v12  ;;  %v531_v13 = vsel %vm464_vm2, %v730_v11, 0.0 }
 0x406   :  { %532 = vadd.xlane.f32.xlu0 %v531_v13 }
 0x407   :  { %v732_v14 = vpop.eup %731 }
 0x408   :  { %v534_v15 = vsel %vm464_vm2, %v732_v14, 0.0 }
 0x409   :  { %535 = vadd.xlane.f32.xlu1 %v534_v15 }
 0x480   :  { %v521_v16 = vpop.xlane.xlu0 %520 }
 0x481   :  { %733 = vlog2.f32 %v521_v16 }
 0x484   :  { %v524_v17 = vpop.xlane.xlu1 %523  ;;  %v515_v18 = vpop.xlane.xlu0 %514 }
 0x485   :  { %735 = vlog2.f32 %v524_v17 }
 0x486   :  { %737 = vlog2.f32 %v515_v18 }
 0x488   :  { %v518_v19 = vpop.xlane.xlu1 %517 }
 0x489   :  { %739 = vlog2.f32 %v518_v19 }
 0x48a   :  { %v527_v20 = vpop.xlane.xlu0 %526 }
 0x48b   :  { %741 = vlog2.f32 %v527_v20 }
 0x48e   :  { %v734_v21 = vpop.eup %733  ;;  %v530_v22 = vpop.xlane.xlu1 %529 }
 0x48f   :  { %v542_v23 = vmul.f32 0.6931472, %v734_v21  ;;  %743 = vlog2.f32 %v530_v22  ;;  %v533_v24 = vpop.xlane.xlu0 %532 }
 0x490   :  { %745 = vlog2.f32 %v533_v24 }
 0x491   :  { %v555_v25 = vsub.f32 %v888_v41, %v542_v23 }
 0x492   :  { %v736_v26 = vpop.eup %735  ;;  %v536_v27 = vpop.xlane.xlu1 %535 }
 0x493   :  { %v738_v28 = vpop.eup %737  ;;  %563 = vst.msk [vmem:[%s966_s6 + $0x10] sm:$0xff] %vm464_vm2, %v555_v25  ;;  %v544_v29 = vmul.f32 0.6931472, %v736_v26  ;;  %747 = vlog2.f32 %v536_v27 }
 0x494   :  { %v538_v30 = vmul.f32 0.6931472, %v738_v28 }
 0x495   :  { %v556_v31 = vsub.f32 %v894_v47, %v544_v29 }
 0x496   :  { %v740_v32 = vpop.eup %739  ;;  %v553_v33 = vsub.f32 %v891_v44, %v538_v30 }
 0x497   :  { %564 = vst.msk [vmem:[%s966_s6 + $0x18] sm:$0xff] %vm464_vm2, %v556_v31  ;;  %v540_v34 = vmul.f32 0.6931472, %v740_v32 }
 0x498   :  { %v742_v35 = vpop.eup %741  ;;  %561 = vst.msk [vmem:[%s966_s6] sm:$0xff] %vm464_vm2, %v553_v33 }
 0x499   :  { %v554_v36 = vsub.f32 %v897_v50, %v540_v34  ;;  %v546_v37 = vmul.f32 0.6931472, %v742_v35 }
 0x49b   :  { %562 = vst.msk [vmem:[%s966_s6 + $0x8] sm:$0xff] %vm464_vm2, %v554_v36  ;;  %v557_v38 = vsub.f32 %v900_v53, %v546_v37 }
 0x49c   :  { %v744_v39 = vpop.eup %743 }
 0x49d   :  { %v746_v40 = vpop.eup %745  ;;  %565 = vst.msk [vmem:[%s966_s6 + $0x20] sm:$0xff] %vm464_vm2, %v557_v38  ;;  %v548_v41 = vmul.f32 0.6931472, %v744_v39 }
 0x49e   :  { %v550_v42 = vmul.f32 0.6931472, %v746_v40 }
 0x49f   :  { %v558_v43 = vsub.f32 %v903_v57, %v548_v41 }
 0x4a0   :  { %v748_v44 = vpop.eup %747  ;;  %v559_v45 = vsub.f32 %v905_v58, %v550_v42 }
 0x4a1   :  { %566 = vst.msk [vmem:[%s966_s6 + $0x28] sm:$0xff] %vm464_vm2, %v558_v43  ;;  %v552_v46 = vmul.f32 0.6931472, %v748_v44 }
 0x4a2   :  { %567 = vst.msk [vmem:[%s966_s6 + $0x30] sm:$0xff] %vm464_vm2, %v559_v45 }
 0x4a3   :  { %v560_v47 = vsub.f32 %v909_v63, %v552_v46 }
 0x4a5   :  { %568 = vst.msk [vmem:[%s966_s6 + $0x38] sm:$0xff] %vm464_vm2, %v560_v47 }

</bundles_post_ra>
